<compile_context>
chip_gen: v7x
topology: tpu7x:2x2x1
jax: 0.10.0
libtpu: 0.0.40
codegen_flags: <defaults>
</compile_context>

<pallas_src>
import math

import jax
import jax.numpy as jnp
from jax.experimental import pallas as pl
from jax.experimental.pallas import tpu as pltpu


def _glu_kernel(x_ref, wa_ref, wg_ref, ba_ref, bg_ref, o_ref, acc_a, acc_g):
    """One (tm, tn) output tile; accumulates over the K (= input feature) grid axis."""
    k = pl.program_id(2)

    @pl.when(k == 0)
    def _():
        # Fold the bias add into the accumulator init (saves two epilogue passes).
        acc_a[...] = jnp.broadcast_to(ba_ref[...], acc_a.shape)
        acc_g[...] = jnp.broadcast_to(bg_ref[...], acc_g.shape)

    x = x_ref[...]
    acc_a[...] += jnp.dot(x, wa_ref[...], preferred_element_type=jnp.float32)
    acc_g[...] += jnp.dot(x, wg_ref[...], preferred_element_type=jnp.float32)

    @pl.when(k == pl.num_programs(2) - 1)
    def _():
        # Epilogue in f32 (sigmoid gate + product); downcast only at the store.
        a = acc_a[...]
        g = acc_g[...]
        o_ref[...] = (a * jax.nn.sigmoid(g)).astype(o_ref.dtype)


def _round_up(x, m):
    return ((x + m - 1) // m) * m


def _vmem_capacity_bytes():
    try:
        return int(pltpu.get_tpu_info().vmem_capacity_bytes)
    except Exception:
        return 64 * 1024 * 1024          # conservative fallback (v7x-sized)


def _pick_k_tile(d, preferred):
    """Contraction-dim tile: must divide D exactly (OOB garbage would corrupt the
    accumulation). Multiple of 128 when possible, otherwise the full dimension."""
    if d <= preferred or d % 128 != 0:
        return d
    t = (min(preferred, d) // 128) * 128
    while t >= 128 and d % t != 0:
        t -= 128
    return t if t >= 128 else d


def prepare_glu_params(w, b, matmul_dtype=jnp.bfloat16):
    """Split the nn.Linear weight/bias into GLU value/gate halves ONCE, at model load.

    w: (2H, D) PyTorch-layout weight; b: (2H,) bias.
    Returns (wa, wg, ba, bg): wa/wg (D, H) in matmul_dtype, ba/bg (1, H) f32.
    """
    two_h, d = w.shape
    assert two_h % 2 == 0, "out_features of the GLU linear must be even"
    assert b.shape == (two_h,)
    h = two_h // 2
    wa = jnp.asarray(w[:h, :].T, dtype=matmul_dtype)     # (D, H)  value half
    wg = jnp.asarray(w[h:, :].T, dtype=matmul_dtype)     # (D, H)  gate half
    ba = jnp.asarray(b[:h], dtype=jnp.float32).reshape(1, h)
    bg = jnp.asarray(b[h:], dtype=jnp.float32).reshape(1, h)
    return wa, wg, ba, bg


def gated_linear_unit_prepared(x, wa, wg, ba, bg, *,
                               tile_m=None, tile_n=None, tile_k=None):
    """glu(concat(x@wa+ba, x@wg+bg)) with pre-split weights. x: (..., D) -> (..., H)."""
    orig_shape = x.shape
    d, h = wa.shape
    assert orig_shape[-1] == d and wg.shape == (d, h)
    assert ba.shape == (1, h) and bg.shape == (1, h)

    m = int(math.prod(orig_shape[:-1])) if len(orig_shape) > 1 else 1
    mm_dtype = wa.dtype
    mm_bytes = jnp.dtype(mm_dtype).itemsize
    out_dtype = x.dtype
    out_bytes = jnp.dtype(out_dtype).itemsize
    sub = max(8, 32 // mm_bytes)          # sublane packing: 8 f32, 16 bf16, 32 int8/fp8

    x2d = x.reshape(m, d).astype(mm_dtype)

    vmem_cap = _vmem_capacity_bytes()
    vmem_budget = (vmem_cap * 3) // 4     # v7x ~48 MiB, v5e/v6e ~96 MiB

    # --- tile selection ---
    auto = tile_m is None and tile_n is None and tile_k is None
    tm_pref = 1024 if tile_m is None else tile_m
    tn_pref = 512 if tile_n is None else tile_n
    tk_pref = 512 if tile_k is None else tile_k

    # Weights-resident fast path: both GLU weight halves fetched exactly once per call.
    full_w_bytes = 2 * d * h * mm_bytes
    if auto and full_w_bytes <= vmem_budget // 3:
        tn_pref = max(tn_pref, h)
        tk_pref = max(tk_pref, d)

    # M tile: multiple of the sublane packing, or the full flattened M.
    tm = m if m <= tm_pref else max(sub, (tm_pref // sub) * sub)
    # N tile (output lanes): multiple of 128, or the full H.
    tn = h if h <= tn_pref else max(128, (tn_pref // 128) * 128)
    # K tile: must divide D exactly.
    tk = _pick_k_tile(d, tk_pref)

    def _working_bytes(tm_, tn_, tk_):
        return (2 * (tm_ * tk_ * mm_bytes          # x tile (double buffered)
                     + 2 * tk_ * tn_ * mm_bytes    # W_a + W_g tiles
                     + tm_ * tn_ * out_bytes       # output tile
                     + 2 * tn_ * 4)                # bias rows
                + 2 * tm_ * tn_ * 4)               # f32 accumulators

    # Clamp tiles to the generation's VMEM budget (rarely triggers with default tiles).
    # TODO(synk): for very large H or D that are not multiples of 128 the full-dim fallback
    # tile may still exceed the budget; padding H/D in the wrapper would cover that case.
    for _ in range(12):
        if _working_bytes(tm, tn, tk) <= vmem_budget:
            break
        if tm >= 2 * sub:
            tm = max(sub, _round_up(tm // 2, sub))
        elif tn > 128 and tn % 128 == 0:
            tn = max(128, ((tn // 2) // 128) * 128)
        elif tk > 128 and tk % 128 == 0 and d % 128 == 0:
            tk = _pick_k_tile(d, max(128, tk // 2))
        else:
            break

    grid_m = pl.cdiv(m, tm)
    grid_n = pl.cdiv(h, tn)
    if grid_m * grid_n < 2 and m >= 2 * sub:
        # v7x has 2 TensorCores; give the parallel grid axes at least 2 blocks.
        tm = max(sub, _round_up(pl.cdiv(m, 2), sub))
        grid_m = pl.cdiv(m, tm)
    grid_k = d // tk
    grid = (grid_m, grid_n, grid_k)

    working = _working_bytes(tm, tn, tk)
    vmem_limit = int(min(max(working * 5 // 4, 32 * 1024 * 1024), (vmem_cap * 15) // 16))

    cost = pl.CostEstimate(
        flops=4 * m * d * h,
        transcendentals=m * h,
        bytes_accessed=(m * d * mm_bytes + 2 * d * h * mm_bytes
                        + 2 * h * 4 + m * h * out_bytes),
    )

    out = pl.pallas_call(
        _glu_kernel,
        out_shape=jax.ShapeDtypeStruct((m, h), out_dtype),
        grid_spec=pltpu.PrefetchScalarGridSpec(
            num_scalar_prefetch=0,
            grid=grid,
            in_specs=[
                pl.BlockSpec((tm, tk), lambda i, j, k: (i, k)),   # x tile
                pl.BlockSpec((tk, tn), lambda i, j, k: (k, j)),   # W_a tile
                pl.BlockSpec((tk, tn), lambda i, j, k: (k, j)),   # W_g tile
                pl.BlockSpec((1, tn), lambda i, j, k: (0, j)),    # bias_a row
                pl.BlockSpec((1, tn), lambda i, j, k: (0, j)),    # bias_g row
            ],
            out_specs=pl.BlockSpec((tm, tn), lambda i, j, k: (i, j)),
            scratch_shapes=[
                pltpu.VMEM((tm, tn), jnp.float32),   # value-half accumulator
                pltpu.VMEM((tm, tn), jnp.float32),   # gate-half accumulator
            ],
        ),
        compiler_params=pltpu.CompilerParams(
            dimension_semantics=("parallel", "parallel", "arbitrary"),
            vmem_limit_bytes=vmem_limit,
        ),
        cost_estimate=cost,
    )(x2d, wa, wg, ba, bg)

    return out.reshape(*orig_shape[:-1], h)


def gated_linear_unit(x, w, b, *, matmul_dtype=jnp.bfloat16,
                      tile_m=None, tile_n=None, tile_k=None):
    """Pallas implementation of GatedLinearUnit.forward (inference).

    x: (..., D), w: (2H, D) PyTorch layout, b: (2H,). Returns glu(x @ w.T + b, dim=-1).
    Prefer prepare_glu_params() once at model load + gated_linear_unit_prepared() per call;
    under jit this wrapper's weight split/transpose/cast is constant-folded anyway.
    """
    # TODO(synk): nn.Dropout precedes the linear in the module; it is identity at inference
    # (and for dropout=0.0), so it is not implemented in-kernel.
    wa, wg, ba, bg = prepare_glu_params(w, b, matmul_dtype)
    return gated_linear_unit_prepared(x, wa, wg, ba, bg,
                                      tile_m=tile_m, tile_n=tile_n, tile_k=tile_k)


def init_params(input_size, hidden_size, key):
    """xavier_uniform weight (2H, D) + zero bias, matching reset_parameters()."""
    two_h = 2 * hidden_size
    bound = math.sqrt(6.0 / (input_size + two_h))
    w = jax.random.uniform(key, (two_h, input_size), jnp.float32, -bound, bound)
    b = jnp.zeros((two_h,), jnp.float32)
    return w, b


def reference(x, w, b):
    y = x @ w.T + b
    h = y.shape[-1] // 2
    return y[..., :h] * jax.nn.sigmoid(y[..., h:])


if __name__ == "__main__":
    key = jax.random.PRNGKey(0)
    k1, k2, k3, k4, k5, k6 = jax.random.split(key, 6)

    # Small shapes consistent with the module: batch=2, seq=8, input_size=64, hidden=32.
    batch, seq, input_size, hidden = 2, 8, 64, 32
    x = jax.random.normal(k1, (batch, seq, input_size), jnp.float32)
    w, b = init_params(input_size, hidden, k2)
    ref = reference(x, w, b)

    # Default path: bf16 MXU operands, f32 accumulate, prepared (load-time) weights.
    params = prepare_glu_params(w, b)                       # done once at "model load"
    out = jax.block_until_ready(gated_linear_unit_prepared(x, *params))
    assert out.shape == (batch, seq, hidden), out.shape
    assert jnp.allclose(out, ref, atol=5e-2, rtol=5e-2), float(jnp.max(jnp.abs(out - ref)))

    # f32-operand path.
    out_f32 = jax.block_until_ready(gated_linear_unit(x, w, b, matmul_dtype=jnp.float32))
    assert out_f32.shape == (batch, seq, hidden), out_f32.shape
    assert jnp.allclose(out_f32, ref, atol=5e-3, rtol=5e-3), float(jnp.max(jnp.abs(out_f32 - ref)))

    # Exercise partial-M edge blocks + N/K tiling + the K accumulation loop with forced tiles.
    batch2, seq2, d2, h2 = 2, 100, 256, 256                 # M=200 is not a multiple of tm=64
    x2 = jax.random.normal(k3, (batch2, seq2, d2), jnp.float32)
    w2, b2 = init_params(d2, h2, k4)
    out2 = jax.block_until_ready(
        gated_linear_unit(x2, w2, b2, matmul_dtype=jnp.float32,
                          tile_m=64, tile_n=128, tile_k=128))
    ref2 = reference(x2, w2, b2)
    assert out2.shape == (batch2, seq2, h2), out2.shape
    assert jnp.allclose(out2, ref2, atol=5e-3, rtol=5e-3), float(jnp.max(jnp.abs(out2 - ref2)))

    # Exercise a partial-N edge block (H=192 with tn=128).
    batch3, seq3, d3, h3 = 2, 16, 128, 192
    x3 = jax.random.normal(k5, (batch3, seq3, d3), jnp.float32)
    w3, b3 = init_params(d3, h3, k6)
    out3 = jax.block_until_ready(
        gated_linear_unit(x3, w3, b3, matmul_dtype=jnp.float32,
                          tile_m=32, tile_n=128, tile_k=128))
    ref3 = reference(x3, w3, b3)
    assert out3.shape == (batch3, seq3, h3), out3.shape
    assert jnp.allclose(out3, ref3, atol=5e-3, rtol=5e-3), float(jnp.max(jnp.abs(out3 - ref3)))

    print("KERNEL_OK")
</pallas_src>

<mosaic_0001>
module attributes {stable_mosaic.version = 11 : i64} {
  func.func @_glu_kernel(%arg0: i32, %arg1: i32, %arg2: i32, %arg3: memref<16x64xbf16, #tpu.memory_space<vmem>>, %arg4: memref<64x32xbf16, #tpu.memory_space<vmem>>, %arg5: memref<64x32xbf16, #tpu.memory_space<vmem>>, %arg6: memref<1x32xf32, #tpu.memory_space<vmem>>, %arg7: memref<1x32xf32, #tpu.memory_space<vmem>>, %arg8: memref<16x32xf32, #tpu.memory_space<vmem>>, %arg9: memref<16x32xf32, #tpu.memory_space<vmem>>, %arg10: memref<16x32xf32, #tpu.memory_space<vmem>>) attributes {dimension_semantics = [#tpu.dimension_semantics<parallel>, #tpu.dimension_semantics<parallel>, #tpu.dimension_semantics<arbitrary>], iteration_bounds = array<i64: 1, 1, 1>, scalar_prefetch = 0 : i64, scratch_operands = 2 : i64, tpu.core_type = #tpu.core_type<tc>, window_params = [{transform_indices = @transform_0, window_bounds = array<i64: 16, 64>}, {transform_indices = @transform_1, window_bounds = array<i64: 64, 32>}, {transform_indices = @transform_2, window_bounds = array<i64: 64, 32>}, {transform_indices = @transform_3, window_bounds = array<i64: 1, 32>}, {transform_indices = @transform_4, window_bounds = array<i64: 1, 32>}, {transform_indices = @transform_5, window_bounds = array<i64: 16, 32>}]} {
    %c0_i32 = arith.constant 0 : i32
    %0 = arith.cmpi eq, %arg2, %c0_i32 : i32
    %1 = arith.extui %0 : i1 to i32
    %c0_i32_0 = arith.constant 0 : i32
    %2 = arith.cmpi ne, %1, %c0_i32_0 : i32
    scf.if %2 {
      %c0_17 = arith.constant 0 : index
      %c0_18 = arith.constant 0 : index
      %17 = vector.load %arg6[%c0_17, %c0_18] : memref<1x32xf32, #tpu.memory_space<vmem>>, vector<1x32xf32>
      %18 = vector.shape_cast %17 : vector<1x32xf32> to vector<1x32xf32>
      %19 = vector.broadcast %18 : vector<1x32xf32> to vector<16x32xf32>
      %c0_19 = arith.constant 0 : index
      %c0_20 = arith.constant 0 : index
      %20 = vector.load %arg9[%c0_19, %c0_20] : memref<16x32xf32, #tpu.memory_space<vmem>>, vector<16x32xf32>
      tpu.vector_store %arg9[%c0_19, %c0_20], %19 {strides = array<i32>} : memref<16x32xf32, #tpu.memory_space<vmem>>, vector<16x32xf32>,
      %c0_21 = arith.constant 0 : index
      %c0_22 = arith.constant 0 : index
      %21 = vector.load %arg7[%c0_21, %c0_22] : memref<1x32xf32, #tpu.memory_space<vmem>>, vector<1x32xf32>
      %22 = vector.shape_cast %21 : vector<1x32xf32> to vector<1x32xf32>
      %23 = vector.broadcast %22 : vector<1x32xf32> to vector<16x32xf32>
      %c0_23 = arith.constant 0 : index
      %c0_24 = arith.constant 0 : index
      %24 = vector.load %arg10[%c0_23, %c0_24] : memref<16x32xf32, #tpu.memory_space<vmem>>, vector<16x32xf32>
      tpu.vector_store %arg10[%c0_23, %c0_24], %23 {strides = array<i32>} : memref<16x32xf32, #tpu.memory_space<vmem>>, vector<16x32xf32>,
    } else {
    }
    %c0 = arith.constant 0 : index
    %c0_1 = arith.constant 0 : index
    %3 = vector.load %arg3[%c0, %c0_1] : memref<16x64xbf16, #tpu.memory_space<vmem>>, vector<16x64xbf16>
    %c0_2 = arith.constant 0 : index
    %c0_3 = arith.constant 0 : index
    %4 = vector.load %arg9[%c0_2, %c0_3] : memref<16x32xf32, #tpu.memory_space<vmem>>, vector<16x32xf32>
    %c0_4 = arith.constant 0 : index
    %c0_5 = arith.constant 0 : index
    %5 = vector.load %arg4[%c0_4, %c0_5] : memref<64x32xbf16, #tpu.memory_space<vmem>>, vector<64x32xbf16>
    %cst = arith.constant dense<0.000000e+00> : vector<16x32xf32>
    %6 = tpu.matmul %3, %5, %cst {dimension_numbers = #tpu.dot_dimension_numbers<[1], [0], [0], [1], [0, 0, 1, 1], [], []>} : vector<16x64xbf16>, vector<64x32xbf16>, vector<16x32xf32> -> vector<16x32xf32>
    %7 = arith.addf %4, %6 : vector<16x32xf32>
    %c0_6 = arith.constant 0 : index
    %c0_7 = arith.constant 0 : index
    %8 = vector.load %arg9[%c0_6, %c0_7] : memref<16x32xf32, #tpu.memory_space<vmem>>, vector<16x32xf32>
    tpu.vector_store %arg9[%c0_6, %c0_7], %7 {strides = array<i32>} : memref<16x32xf32, #tpu.memory_space<vmem>>, vector<16x32xf32>,
    %c0_8 = arith.constant 0 : index
    %c0_9 = arith.constant 0 : index
    %9 = vector.load %arg10[%c0_8, %c0_9] : memref<16x32xf32, #tpu.memory_space<vmem>>, vector<16x32xf32>
    %c0_10 = arith.constant 0 : index
    %c0_11 = arith.constant 0 : index
    %10 = vector.load %arg5[%c0_10, %c0_11] : memref<64x32xbf16, #tpu.memory_space<vmem>>, vector<64x32xbf16>
    %cst_12 = arith.constant dense<0.000000e+00> : vector<16x32xf32>
    %11 = tpu.matmul %3, %10, %cst_12 {dimension_numbers = #tpu.dot_dimension_numbers<[1], [0], [0], [1], [0, 0, 1, 1], [], []>} : vector<16x64xbf16>, vector<64x32xbf16>, vector<16x32xf32> -> vector<16x32xf32>
    %12 = arith.addf %9, %11 : vector<16x32xf32>
    %c0_13 = arith.constant 0 : index
    %c0_14 = arith.constant 0 : index
    %13 = vector.load %arg10[%c0_13, %c0_14] : memref<16x32xf32, #tpu.memory_space<vmem>>, vector<16x32xf32>
    tpu.vector_store %arg10[%c0_13, %c0_14], %12 {strides = array<i32>} : memref<16x32xf32, #tpu.memory_space<vmem>>, vector<16x32xf32>,
    %c0_i32_15 = arith.constant 0 : i32
    %14 = arith.cmpi eq, %arg2, %c0_i32_15 : i32
    %15 = arith.extui %14 : i1 to i32
    %c0_i32_16 = arith.constant 0 : i32
    %16 = arith.cmpi ne, %15, %c0_i32_16 : i32
    scf.if %16 {
      %c0_17 = arith.constant 0 : index
      %c0_18 = arith.constant 0 : index
      %17 = vector.load %arg9[%c0_17, %c0_18] : memref<16x32xf32, #tpu.memory_space<vmem>>, vector<16x32xf32>
      %c0_19 = arith.constant 0 : index
      %c0_20 = arith.constant 0 : index
      %18 = vector.load %arg10[%c0_19, %c0_20] : memref<16x32xf32, #tpu.memory_space<vmem>>, vector<16x32xf32>
      %19 = arith.negf %18 : vector<16x32xf32>
      %20 = math.exp %19 : vector<16x32xf32>
      %cst_21 = arith.constant 1.000000e+00 : f32
      %21 = vector.broadcast %cst_21 : f32 to vector<16x32xf32>
      %22 = arith.addf %21, %20 : vector<16x32xf32>
      %23 = arith.divf %21, %22 : vector<16x32xf32>
      %24 = arith.mulf %17, %23 : vector<16x32xf32>
      %c0_22 = arith.constant 0 : index
      %c0_23 = arith.constant 0 : index
      %25 = vector.load %arg8[%c0_22, %c0_23] : memref<16x32xf32, #tpu.memory_space<vmem>>, vector<16x32xf32>
      tpu.vector_store %arg8[%c0_22, %c0_23], %24 {strides = array<i32>} : memref<16x32xf32, #tpu.memory_space<vmem>>, vector<16x32xf32>,
    } else {
    }
    return
  }
  func.func @transform_0(%arg0: i32, %arg1: i32, %arg2: i32) -> (i32, i32) {
    %c0_i32 = arith.constant 0 : i32
    return %arg0, %arg2 : i32, i32
  }
  func.func @transform_1(%arg0: i32, %arg1: i32, %arg2: i32) -> (i32, i32) {
    %c0_i32 = arith.constant 0 : i32
    return %arg2, %arg1 : i32, i32
  }
  func.func @transform_2(%arg0: i32, %arg1: i32, %arg2: i32) -> (i32, i32) {
    %c0_i32 = arith.constant 0 : i32
    return %arg2, %arg1 : i32, i32
  }
  func.func @transform_3(%arg0: i32, %arg1: i32, %arg2: i32) -> (i32, i32) {
    %c0_i32 = arith.constant 0 : i32
    %c0_i32_0 = arith.constant 0 : i32
    return %c0_i32, %arg1 : i32, i32
  }
  func.func @transform_4(%arg0: i32, %arg1: i32, %arg2: i32) -> (i32, i32) {
    %c0_i32 = arith.constant 0 : i32
    %c0_i32_0 = arith.constant 0 : i32
    return %c0_i32, %arg1 : i32, i32
  }
  func.func @transform_5(%arg0: i32, %arg1: i32, %arg2: i32) -> (i32, i32) {
    %c0_i32 = arith.constant 0 : i32
    return %arg0, %arg1 : i32, i32
  }
}

</mosaic_0001>

<bundles_post_ra>
// kernel: tpu_custom_call.1
= control target key start
LH: loop header
LB: loop body
LE: loop exit
PB: predicated region body
PF: predicated region fallthrough
CT: control target
= control target key end

     0   :  { %v349_v1 = vmov 0.0   ;;  %vm350_vm0 = vmmov 0   ;;  %vm33_vm1 = vcmask 261120   ;;  %s439_s0 = inlined_call_operand.vmem [shape: bf16[16,64], index: 0, kind: input, shape index: {}]   ;;  %s440_s1 = inlined_call_operand.vmem [shape: bf16[64,32], index: 1, kind: input, shape index: {}]   ;;  %s441_s2 = inlined_call_operand.vmem [shape: bf16[64,32], index: 2, kind: input, shape index: {}]   ;;  %s442_s3 = inlined_call_operand.vmem [shape: f32[1,32], index: 3, kind: input, shape index: {}]   ;;  %s443_s4 = inlined_call_operand.vmem [shape: f32[1,32], index: 4, kind: input, shape index: {}]   ;;  %s444_s5 = inlined_call_operand.hbm [shape: f32[16,32], index: 5, kind: output, shape index: {}]  }
   0x1   :  { %v308_v0 = vld [vmem:[%s441_s2] sm:$0xff]   ;;  %291 = vmatprep.subr.bf16.mxu1 %v349_v1  ;;  %279 = vmatprep.subr.bf16.mxu0 %v349_v1  ;;  %v309_v2 = vld [vmem:[%s441_s2 + $0x8] sm:$0xff]   ;;  %v310_v4 = vld [vmem:[%s441_s2 + $0x10] sm:$0xff]  }
   0x2   :  { %292 = vmatpush3.bf16.msra.mxu1 %v308_v0  ;;  %299 = vmatprep.mubr.msk.bf16.mxu1 %vm350_vm0, %v349_v1  ;;  %v313_v3 = vld [vmem:[%s440_s1] sm:$0xff]   ;;  %v314_v5 = vld [vmem:[%s440_s1 + $0x8] sm:$0xff]  }
   0x3   :  { %293 = vmatprep.subr.bf16.mxu1 %v349_v1  ;;  %287 = vmatprep.mubr.msk.bf16.mxu0 %vm350_vm0, %v349_v1  ;;  %v255_v6 = vld [vmem:[%s443_s4] ss:$0 sm:$0xff] }
   0x4   :  { %280 = vmatpush3.bf16.msra.mxu0 %v313_v3 }
   0x5   :  { %281 = vmatprep.subr.bf16.mxu0 %v349_v1 }
   0x6   :  { %294 = vmatpush3.bf16.msra.mxu1 %v309_v2 }
   0x7   :  { %295 = vmatprep.subr.bf16.mxu1 %v349_v1 }
   0x8   :  { %10 = vsyncpa [#allocation5], 0  ;;  %v311_v7 = vld [vmem:[%s441_s2 + $0x18] sm:$0xff]   ;;  %43 = vst.msk [vmem:[#allocation3] sm:$0xff] %vm33_vm1, %v255_v6  ;;  %282 = vmatpush3.bf16.msra.mxu0 %v314_v5  ;;  %v315_v8 = vld [vmem:[%s440_s1 + $0x10] sm:$0xff]   ;;  %vm86_vm2 = vcmask 523264  }
   0x9   :  { %44 = vst.msk [vmem:[#allocation3 + $0x8] sm:$0xff] %vm33_vm1, %v255_v6  ;;  %283 = vmatprep.subr.bf16.mxu0 %v349_v1  ;;  %v312_v9 = vld [vmem:[%s439_s0] sm:$0xff]   ;;  %v316_v10 = vld [vmem:[%s440_s1 + $0x18] sm:$0xff]   ;;  %s351_s0 = smov [#allocation4]  }
   0xa   :  { %296 = vmatpush3.bf16.msra.mxu1 %v310_v4  ;;  %v254_v11 = vld [vmem:[%s442_s3] ss:$0 sm:$0xff]  ;;  %s243_s1 = sshll.u32 %s351_s0, 4  ;;  %s244_s1 = int_to_ptr.vmem [resolvable:$true] %s243_s1 }
   0xb   :  { %297 = vmatprep.subr.bf16.mxu1 %v349_v1  ;;  %34 = vst.msk [vmem:[#allocation2] sm:$0xff] %vm33_vm1, %v254_v11  ;;  %35 = vst.msk [vmem:[#allocation2 + $0x8] sm:$0xff] %vm33_vm1, %v254_v11  ;;  %s325_s3 = scalar_lea.vmem %s244_s1, 256  ;;  %p330_p1 = scmp.lt.s32.totalorder %s244_s1, %s244_s1 }
   0xc   :  { %284 = vmatpush3.bf16.msra.mxu0 %v315_v8  ;;  %p326_p0 = scmp.ne.s32.totalorder %s244_s1, %s325_s3  ;;  %p331_p2 = scmp.lt.s32.totalorder %s325_s3, %s325_s3 }
   0xd   :  { %285 = vmatprep.subr.bf16.mxu0 %v349_v1 }
   0xe   :  { %298 = vmatpush3.bf16.msra.mxu1 %v311_v7  ;;  %p332_p3 = por %p331_p2, %p330_p1 }
   0xf   :  { %v136_v12 = vld [vmem:[#allocation3] sm:$0xff] }
  0x10   :  { %286 = vmatpush3.bf16.msra.mxu0 %v316_v10  ;;  %v137_v14 = vld [vmem:[#allocation3 + $0x8] sm:$0xff]  ;;  %p333_p4 = pnand %p332_p3, %p326_p0 }
  0x11   :  { %300 = vmatmul.mubr.msk.bf16.vlgmr.msra.gmra.mrb[0].mxu1 %vm86_vm2, %v312_v9 }
  0x12   :  { %v47_v20 = vld [vmem:[#allocation2] sm:$0xff]  ;;  %v48_v22 = vld [vmem:[#allocation2 + $0x8] sm:$0xff] }
  0x13   :  { %288 = vmatmul.mubr.msk.bf16.vlgmr.msra.gmra.mrb[0].mxu0 %vm86_vm2, %v312_v9 }
  0xe4   :  { %v204_v13 = vpop.f32.mrb[0].mxu1 }
  0xe5   :  { %v211_v15 = vadd.f32 %v204_v13, %v136_v12  ;;  %v301_v16 = vpop.f32.mrb[1].mxu1 }
  0xe6   :  { %v207_v17 = vpop.f32.mrb[2].mxu1  ;;  %v124_v21 = vpop.f32.mrb[0].mxu0 }
  0xe7   :  { %213 = vst.msk [vmem:[#allocation3] sm:$0xff] %vm33_vm1, %v211_v15  ;;  %v212_v18 = vadd.f32 %v207_v17, %v137_v14  ;;  %v302_v19 = vpop.f32.mrb[3].mxu1  ;;  %v131_v23 = vadd.f32 %v124_v21, %v47_v20  ;;  %v289_v24 = vpop.f32.mrb[1].mxu0 }
  0xe8   :  { %v127_v25 = vpop.f32.mrb[2].mxu0 }
  0xe9   :  { %214 = vst.msk [vmem:[#allocation3 + $0x8] sm:$0xff] %vm33_vm1, %v212_v18  ;;  %134 = vst.msk [vmem:[#allocation2] sm:$0xff] %vm33_vm1, %v131_v23  ;;  %v132_v26 = vadd.f32 %v127_v25, %v48_v22  ;;  %v290_v27 = vpop.f32.mrb[3].mxu0 }
  0xeb   :  { %135 = vst.msk [vmem:[#allocation2 + $0x8] sm:$0xff] %vm33_vm1, %v132_v26 }
  0xee   :  { %v220_v28 = vld [vmem:[#allocation3] sm:$0xff] }
  0xef   :  { %v267_v29 = vmul.f32 -1.442695, %v220_v28 }
  0xf0   :  { %v221_v30 = vld [vmem:[#allocation3 + $0x8] sm:$0xff]  ;;  %v218_v36 = vld [vmem:[#allocation2] sm:$0xff] }
  0xf1   :  { %317 = vpow2.f32 %v267_v29  ;;  %v268_v31 = vmul.f32 -1.442695, %v221_v30 }
  0xf2   :  { %v219_v40 = vld [vmem:[#allocation2 + $0x8] sm:$0xff] }
  0xf3   :  { %319 = vpow2.f32 %v268_v31 }
  0xfb   :  { %v318_v32 = vpop.eup %317 }
  0xfc   :  { %v228_v33 = vadd.f32 1.0, %v318_v32 }
  0xfd   :  { %v320_v34 = vpop.eup %319 }
  0xfe   :  { %v229_v35 = vadd.f32 1.0, %v320_v34  ;;  %321 = vrcp.f32 %v228_v33 }
 0x100   :  { %323 = vrcp.f32 %v229_v35 }
 0x108   :  { %v322_v37 = vpop.eup %321 }
 0x109   :  { %v234_v38 = vmul.f32 %v322_v37, %v218_v36 }
 0x10a   :  { %v324_v39 = vpop.eup %323 }
 0x10b   :  { %v235_v41 = vmul.f32 %v324_v39, %v219_v40  ;;  %236 = vst.msk [vmem:[#allocation4] sm:$0xff] %vm33_vm1, %v234_v38 }
 0x10d   :  { %237 = vst.msk [vmem:[#allocation4 + $0x8] sm:$0xff] %vm33_vm1, %v235_v41 }
 0x10e   :  { %336 = shalt.err (!%p333_p4)
}
 0x10f   :  { %s337_s15 = scalar_lea.hbm %s444_s5, 256 }
 0x110   :  { %p338_p5 = scmp.ne.s32.totalorder %s444_s5, %s337_s15  ;;  %p341_p6 = scmp.lt.u32.totalorder %s337_s15, %s444_s5 }
 0x112   :  { %p343_p7 = pnand %p341_p6, %p338_p5 }
 0x114   :  { %346 = shalt.err (!%p343_p7)
}
 0x115   :  { %s352_s20 = smov 128   ;;  %s353_s21 = smov 8  }
 0x116   :  { %249 = dma.vmem_to_hbm [thread:$0]  %s244_s1, 256, %s444_s5, [#allocation5], %s352_s20, %s352_s20, %s353_s21  }
 0x117   :  { %347 = dma.done.wait [#allocation5], 256  }
 0x118   :  { %348 = vsyncadd [#allocation5], 4294967040 }
 0x119   :  { %253 = vsyncpa [#allocation5], 1 }

</bundles_post_ra>
